<compile_context>
chip_gen: v7x
topology: tpu7x:2x2x1
jax: 0.10.0
libtpu: 0.0.40
codegen_flags: <defaults>
</compile_context>

<pallas_src>
import jax
import jax.numpy as jnp
from jax import lax
from jax.experimental import pallas as pl
from jax.experimental.pallas import tpu as pltpu

EPS = 1e-5
LANES = 128
STAT_ROWS = 8            # sublane-aligned stats accumulator block (rows 0/1 used)


def _round_up(x, m):
    return -(-x // m) * m


def _vmem_cap_bytes():
    """~75% of physical VMEM, never above 100 MiB (48 MiB on v7x, 96 MiB on v5e/v6e)."""
    try:
        phys = int(pltpu.get_tpu_info().vmem_capacity_bytes)
    except Exception:
        phys = 64 << 20          # v7x has the smallest VMEM -> conservative fallback
    return min(100 << 20, (phys * 3) // 4)


# ---------------- pass-1 kernels: ReLU -> matmul -> per-channel stats [-> y] -----------

def _stats_kernel(x_ref, wt_ref, stats_ref):
    """Recompute path pass 1: accumulate per-channel sum / sumsq of the conv output."""
    @pl.when(pl.program_id(1) == 0)
    def _init():
        stats_ref[...] = jnp.zeros_like(stats_ref)

    x = jnp.maximum(x_ref[...], 0.0)                                    # (tm, K)
    y = jnp.dot(x, wt_ref[...], preferred_element_type=jnp.float32)     # (tm, Cp) on MXU
    stats_ref[0:1, :] += jnp.sum(y, axis=0, keepdims=True)              # direct row updates
    stats_ref[1:2, :] += jnp.sum(y * y, axis=0, keepdims=True)


def _conv_stats_kernel(x_ref, wt_ref, y_ref, stats_ref):
    """Materialize path pass 1: write the conv output y AND accumulate stats."""
    @pl.when(pl.program_id(1) == 0)
    def _init():
        stats_ref[...] = jnp.zeros_like(stats_ref)

    x = jnp.maximum(x_ref[...], 0.0)                                    # (tm, K)
    y = jnp.dot(x, wt_ref[...], preferred_element_type=jnp.float32)     # (tm, Cp)
    y_ref[...] = y.astype(y_ref.dtype)                                  # lane-dense store
    stats_ref[0:1, :] += jnp.sum(y, axis=0, keepdims=True)
    stats_ref[1:2, :] += jnp.sum(y * y, axis=0, keepdims=True)


# ---------------- pass-2 kernels: folded BatchNorm apply --------------------------------

def _matmul_bn_kernel(x_ref, wt_ref, scale_ref, shift_ref, out_ref):
    """Recompute path pass 2: ReLU -> matmul recompute -> single folded-BN FMA."""
    x = jnp.maximum(x_ref[...], 0.0)
    y = jnp.dot(x, wt_ref[...], preferred_element_type=jnp.float32)
    out_ref[...] = (y * scale_ref[...] + shift_ref[...]).astype(out_ref.dtype)


def _bn_apply_kernel(y_ref, scale_ref, shift_ref, out_ref):
    """Materialize path pass 2: pure elementwise folded BN over the stored conv output."""
    y = y_ref[...].astype(jnp.float32)
    out_ref[...] = (y * scale_ref[...] + shift_ref[...]).astype(out_ref.dtype)


# ---------------- wrapper ---------------------------------------------------------------

def relu_conv_bn(x_nchw, weight, gamma, beta, *, stride=1, padding=0, eps=EPS,
                 compute_dtype=jnp.float32, out_dtype=jnp.float32,
                 out_layout="NCHW", materialize=None, tm=None):
    """ReLU -> Conv2d(weight, stride, padding, bias=False) -> BatchNorm2d (batch stats).

    x_nchw: (N, C_in, H, W); weight: (C_out, C_in, k, k) (PyTorch layout); gamma/beta: (C_out,)
    compute_dtype: dtype of the big xcol / weight streams (bf16 halves HBM reads;
                   statistics and BN math always stay f32).
    """
    N, C_in, H, W = x_nchw.shape
    C_out, C_in_w, kh, kw = weight.shape
    assert C_in_w == C_in and kh == kw, "square kernels, matching channels"
    k = kh
    Ho = (H + 2 * padding - k) // stride + 1
    Wo = (W + 2 * padding - k) // stride + 1
    M = N * Ho * Wo
    K = k * k * C_in
    Cp = _round_up(C_out, LANES)          # lane-dense padded output channels

    # HBM-byte-driven decision: recompute = 2*M*K + M*Cp  vs  materialize = M*K + 3*M*Cp
    if materialize is None:
        materialize = K >= 2 * Cp

    # ---- wrapper glue: NCHW -> NHWC, zero-pad, im2col patches -> (M, K) channels-last --
    # TODO(synk): replace the k>1 patch materialization with an in-kernel tap axis.
    x_nhwc = jnp.transpose(x_nchw, (0, 2, 3, 1))
    if padding:
        x_nhwc = jnp.pad(x_nhwc, ((0, 0), (padding, padding), (padding, padding), (0, 0)))
    if k == 1 and stride == 1:
        xcol = x_nhwc.reshape(M, C_in)    # pure reshape, no HBM blowup
    else:
        slabs = []
        for ki in range(k):
            for kj in range(k):
                slabs.append(x_nhwc[:, ki:ki + (Ho - 1) * stride + 1:stride,
                                       kj:kj + (Wo - 1) * stride + 1:stride, :])
        xcol = jnp.concatenate(slabs, axis=-1).reshape(M, K)

    # weight (C_out, C_in, kh, kw) -> (K, Cp): row order (kh, kw, C_in) matches patches.
    wt = jnp.transpose(weight, (2, 3, 1, 0)).reshape(K, C_out)
    wt = jnp.pad(wt, ((0, 0), (0, Cp - C_out))).astype(compute_dtype)
    gamma_p = jnp.pad(gamma.astype(jnp.float32), (0, Cp - C_out))   # padded chans -> 0
    beta_p = jnp.pad(beta.astype(jnp.float32), (0, Cp - C_out))

    # ---- generation-aware tile-size / scoped-VMEM budgeting ----
    bpe_in = jnp.dtype(compute_dtype).itemsize
    y_dtype = jnp.float32 if jnp.dtype(compute_dtype) == jnp.dtype(jnp.float32) \
        else jnp.dtype(compute_dtype)
    bpe_y = jnp.dtype(y_dtype).itemsize
    bpe_out = jnp.dtype(out_dtype).itemsize
    cap = _vmem_cap_bytes()

    def _need(rows):
        # 2 buffers per pipelined operand (weight counted at 2 buffers too; see TODO).
        w_b = 2 * K * Cp * bpe_in
        st_b = 2 * STAT_ROWS * Cp * 4 + 4 * Cp * 4
        if materialize:
            p1 = 2 * rows * K * bpe_in + w_b + 2 * rows * Cp * bpe_y + st_b
            p2 = 2 * rows * Cp * bpe_y + 2 * rows * Cp * bpe_out + st_b
        else:
            p1 = 2 * rows * K * bpe_in + w_b + st_b
            p2 = 2 * rows * K * bpe_in + w_b + 2 * rows * Cp * bpe_out + st_b
        return max(p1, p2)

    if tm is None:
        tm = 128
        for cand in (1024, 512, 256, 128):
            if _need(cand) * 5 // 4 <= cap:
                tm = cand
                break
    tm = int(max(8, min(_round_up(tm, 8), _round_up(M, 8))))
    vmem_bytes = int(min(cap, max(2 * _need(tm), 32 << 20)))

    # ---- row padding / per-core split (zero rows contribute 0 to the sums) ----
    Mp = _round_up(M, tm)
    n_tiles = Mp // tm
    split = 2 if n_tiles >= 2 else 1        # per-core partial stats (v7x has 2 TCs)
    tiles_per_core = -(-n_tiles // split)
    Mp = split * tiles_per_core * tm
    n_tiles = split * tiles_per_core
    xcol = jnp.pad(xcol, ((0, Mp - M), (0, 0))).astype(compute_dtype)

    # ---- pass 1: single sweep over xcol for statistics (and y on the materialize path) --
    x_spec = pl.BlockSpec((tm, K), lambda c, i: (c * tiles_per_core + i, 0))
    w_spec = pl.BlockSpec((K, Cp), lambda c, i: (0, 0))
    stats_spec = pl.BlockSpec((STAT_ROWS, Cp), lambda c, i: (c, 0))
    stats_shape = jax.ShapeDtypeStruct((split * STAT_ROWS, Cp), jnp.float32)
    cparams1 = pltpu.CompilerParams(
        dimension_semantics=("parallel", "arbitrary"),   # inner axis carries accumulator
        vmem_limit_bytes=vmem_bytes)

    if materialize:
        y_flat, stats = pl.pallas_call(
            _conv_stats_kernel,
            grid=(split, tiles_per_core),
            in_specs=[x_spec, w_spec],
            out_specs=(pl.BlockSpec((tm, Cp), lambda c, i: (c * tiles_per_core + i, 0)),
                       stats_spec),
            out_shape=(jax.ShapeDtypeStruct((Mp, Cp), y_dtype), stats_shape),
            compiler_params=cparams1,
        )(xcol, wt)
    else:
        y_flat = None
        stats = pl.pallas_call(
            _stats_kernel,
            grid=(split, tiles_per_core),
            in_specs=[x_spec, w_spec],
            out_specs=stats_spec,
            out_shape=stats_shape,
            compiler_params=cparams1,
        )(xcol, wt)

    # ---- fold BN into one per-channel FMA (tiny (Cp,) math, done once) ----
    stats = stats.reshape(split, STAT_ROWS, Cp)
    ch_sum = jnp.sum(stats[:, 0, :], axis=0)            # reduce per-core partials
    ch_sumsq = jnp.sum(stats[:, 1, :], axis=0)
    mean = ch_sum / M
    # TODO(synk): E[y^2]-E[y]^2 can cancel in f32 for very large M / large means; switch
    # to per-channel shifted sums if tighter accuracy is required.
    var = jnp.maximum(ch_sumsq / M - mean * mean, 0.0)   # biased (training-mode) variance
    scale = gamma_p * lax.rsqrt(var + eps)
    shift = beta_p - mean * scale
    scale2 = scale.reshape(1, Cp)
    shift2 = shift.reshape(1, Cp)

    # ---- pass 2: apply folded BN (elementwise over y, or recompute the cheap matmul) ----
    cparams2 = pltpu.CompilerParams(
        dimension_semantics=("parallel",),               # row-parallel; megacore-shardable
        vmem_limit_bytes=vmem_bytes)
    vec_spec = pl.BlockSpec((1, Cp), lambda i: (0, 0))
    out_spec = pl.BlockSpec((tm, Cp), lambda i: (i, 0))  # lane-dense output tiles
    out_shape = jax.ShapeDtypeStruct((Mp, Cp), out_dtype)

    if materialize:
        out_flat = pl.pallas_call(
            _bn_apply_kernel,
            grid=(n_tiles,),
            in_specs=[pl.BlockSpec((tm, Cp), lambda i: (i, 0)), vec_spec, vec_spec],
            out_specs=out_spec,
            out_shape=out_shape,
            compiler_params=cparams2,
        )(y_flat, scale2, shift2)
    else:
        out_flat = pl.pallas_call(
            _matmul_bn_kernel,
            grid=(n_tiles,),
            in_specs=[pl.BlockSpec((tm, K), lambda i: (i, 0)),
                      pl.BlockSpec((K, Cp), lambda i: (0, 0)),
                      vec_spec, vec_spec],
            out_specs=out_spec,
            out_shape=out_shape,
            compiler_params=cparams2,
        )(xcol, wt, scale2, shift2)

    out = out_flat[:M, :C_out].reshape(N, Ho, Wo, C_out)
    if out_layout == "NHWC":
        return out                                        # skip the transpose round-trip
    return jnp.transpose(out, (0, 3, 1, 2))               # PyTorch NCHW at the boundary


def _reference(x, weight, gamma, beta, stride, padding, eps=EPS):
    """Pure-JAX reference mirroring the PyTorch forward (training-mode BN)."""
    xr = jnp.maximum(x, 0.0)
    dn = lax.conv_dimension_numbers(xr.shape, weight.shape, ("NCHW", "OIHW", "NCHW"))
    y = lax.conv_general_dilated(xr, weight, window_strides=(stride, stride),
                                 padding=((padding, padding), (padding, padding)),
                                 dimension_numbers=dn)
    mean = jnp.mean(y, axis=(0, 2, 3), keepdims=True)
    var = jnp.mean((y - mean) ** 2, axis=(0, 2, 3), keepdims=True)
    y_hat = (y - mean) * lax.rsqrt(var + eps)
    return y_hat * gamma.reshape(1, -1, 1, 1) + beta.reshape(1, -1, 1, 1)


if __name__ == "__main__":
    key = jax.random.PRNGKey(0)
    kx, kw1, kg, kb, kw3, kx2, kw4 = jax.random.split(key, 7)

    N, C_in, C_out, H, W = 2, 4, 8, 16, 16
    x = jax.random.normal(kx, (N, C_in, H, W), dtype=jnp.float32)
    gamma = 1.0 + 0.1 * jax.random.normal(kg, (C_out,), dtype=jnp.float32)
    beta = 0.1 * jax.random.normal(kb, (C_out,), dtype=jnp.float32)

    # 1) canonical 1x1 / stride 1 / pad 0 (recompute path); tm=128 exercises the
    #    multi-tile + per-core-partial-stats grid.
    w1 = jax.random.normal(kw1, (C_out, C_in, 1, 1), dtype=jnp.float32) * 0.5
    out1 = jax.block_until_ready(relu_conv_bn(x, w1, gamma, beta, stride=1, padding=0, tm=128))
    ref1 = _reference(x, w1, gamma, beta, 1, 0)
    assert out1.shape == (N, C_out, H, W), out1.shape
    assert jnp.allclose(out1, ref1, atol=5e-4, rtol=5e-4), float(jnp.max(jnp.abs(out1 - ref1)))

    # 1b) NHWC output path (skips the trailing NCHW transpose round-trip)
    out1_nhwc = jax.block_until_ready(
        relu_conv_bn(x, w1, gamma, beta, stride=1, padding=0, out_layout="NHWC"))
    assert jnp.allclose(jnp.transpose(out1_nhwc, (0, 3, 1, 2)), ref1, atol=5e-4, rtol=5e-4)

    # 2) 3x3 / stride 2 / pad 1 (im2col glue, recompute path, f32)
    w3 = jax.random.normal(kw3, (C_out, C_in, 3, 3), dtype=jnp.float32) * 0.2
    out3 = jax.block_until_ready(relu_conv_bn(x, w3, gamma, beta, stride=2, padding=1))
    ref3 = _reference(x, w3, gamma, beta, 2, 1)
    assert out3.shape == (N, C_out, H // 2, W // 2), out3.shape
    assert jnp.allclose(out3, ref3, atol=5e-4, rtol=5e-4), float(jnp.max(jnp.abs(out3 - ref3)))

    # 3) wide-input 3x3 / stride 1 / pad 1: K = 576 >= 2*Cp -> materialize-y path
    C_in_wide, Hs, Ws = 64, 16, 16
    xw = jax.random.normal(kx2, (N, C_in_wide, Hs, Ws), dtype=jnp.float32)
    w4 = jax.random.normal(kw4, (C_out, C_in_wide, 3, 3), dtype=jnp.float32) * 0.05
    out4 = jax.block_until_ready(relu_conv_bn(xw, w4, gamma, beta, stride=1, padding=1, tm=128))
    ref4 = _reference(xw, w4, gamma, beta, 1, 1)
    assert out4.shape == (N, C_out, Hs, Ws), out4.shape
    assert jnp.allclose(out4, ref4, atol=2e-3, rtol=2e-3), float(jnp.max(jnp.abs(out4 - ref4)))

    # 4) bf16 input-stream path (halves dominant HBM reads; stats/FMA stay f32) — loose tol
    out3_bf16 = jax.block_until_ready(
        relu_conv_bn(x, w3, gamma, beta, stride=2, padding=1, compute_dtype=jnp.bfloat16))
    assert jnp.allclose(out3_bf16, ref3, atol=5e-2, rtol=5e-2), \
        float(jnp.max(jnp.abs(out3_bf16 - ref3)))

    print("KERNEL_OK")
</pallas_src>

<mosaic_0001>
module attributes {stable_mosaic.version = 11 : i64} {
  func.func @_stats_kernel(%arg0: i32, %arg1: i32, %arg2: memref<128x4xf32, #tpu.memory_space<vmem>>, %arg3: memref<4x128xf32, #tpu.memory_space<vmem>>, %arg4: memref<8x128xf32, #tpu.memory_space<vmem>>) attributes {dimension_semantics = [#tpu.dimension_semantics<parallel>, #tpu.dimension_semantics<arbitrary>], iteration_bounds = array<i64: 2, 2>, scalar_prefetch = 0 : i64, scratch_operands = 0 : i64, tpu.core_type = #tpu.core_type<tc>, window_params = [{transform_indices = @transform_0, window_bounds = array<i64: 128, 4>}, {pipeline_mode = #tpu.pipeline_mode<synchronous>, transform_indices = @transform_1, window_bounds = array<i64: 4, 128>}, {transform_indices = @transform_2, window_bounds = array<i64: 8, 128>}]} {
    %c0_i32 = arith.constant 0 : i32
    %0 = arith.cmpi eq, %arg1, %c0_i32 : i32
    %1 = arith.extui %0 : i1 to i32
    %c0_i32_0 = arith.constant 0 : i32
    %2 = arith.cmpi ne, %1, %c0_i32_0 : i32
    scf.if %2 {
      %cst_14 = arith.constant 0.000000e+00 : f32
      %19 = vector.broadcast %cst_14 : f32 to vector<8x128xf32>
      %c0_15 = arith.constant 0 : index
      %c0_16 = arith.constant 0 : index
      %20 = vector.load %arg4[%c0_15, %c0_16] : memref<8x128xf32, #tpu.memory_space<vmem>>, vector<8x128xf32>
      tpu.vector_store %arg4[%c0_15, %c0_16], %19 {strides = array<i32>} : memref<8x128xf32, #tpu.memory_space<vmem>>, vector<8x128xf32>,
    } else {
    }
    %c0 = arith.constant 0 : index
    %c0_1 = arith.constant 0 : index
    %3 = vector.load %arg2[%c0, %c0_1] : memref<128x4xf32, #tpu.memory_space<vmem>>, vector<128x4xf32>
    %cst = arith.constant 0.000000e+00 : f32
    %4 = vector.broadcast %cst : f32 to vector<128x4xf32>
    %5 = arith.maximumf %3, %4 : vector<128x4xf32>
    %c0_2 = arith.constant 0 : index
    %c0_3 = arith.constant 0 : index
    %6 = vector.load %arg3[%c0_2, %c0_3] : memref<4x128xf32, #tpu.memory_space<vmem>>, vector<4x128xf32>
    %cst_4 = arith.constant dense<0.000000e+00> : vector<128x128xf32>
    %7 = tpu.matmul %5, %6, %cst_4 {dimension_numbers = #tpu.dot_dimension_numbers<[1], [0], [0], [1], [0, 0, 1, 1], [], []>} : vector<128x4xf32>, vector<4x128xf32>, vector<128x128xf32> -> vector<128x128xf32>
    %c0_5 = arith.constant 0 : index
    %c0_6 = arith.constant 0 : index
    %8 = vector.load %arg4[%c0_5, %c0_6] : memref<8x128xf32, #tpu.memory_space<vmem>>, vector<1x128xf32>
    %cst_7 = arith.constant dense<0.000000e+00> : vector<128xf32>
    %9 = vector.multi_reduction <add>, %7, %cst_7 [0] : vector<128x128xf32> to vector<128xf32>
    %10 = vector.shape_cast %9 : vector<128xf32> to vector<1x128xf32>
    %11 = arith.addf %8, %10 : vector<1x128xf32>
    %c0_8 = arith.constant 0 : index
    %c0_9 = arith.constant 0 : index
    %12 = vector.load %arg4[%c0_8, %c0_9] : memref<8x128xf32, #tpu.memory_space<vmem>>, vector<1x128xf32>
    tpu.vector_store %arg4[%c0_8, %c0_9], %11 {strides = array<i32>} : memref<8x128xf32, #tpu.memory_space<vmem>>, vector<1x128xf32>,
    %c1 = arith.constant 1 : index
    %c0_10 = arith.constant 0 : index
    %13 = vector.load %arg4[%c1, %c0_10] : memref<8x128xf32, #tpu.memory_space<vmem>>, vector<1x128xf32>
    %14 = arith.mulf %7, %7 : vector<128x128xf32>
    %cst_11 = arith.constant dense<0.000000e+00> : vector<128xf32>
    %15 = vector.multi_reduction <add>, %14, %cst_11 [0] : vector<128x128xf32> to vector<128xf32>
    %16 = vector.shape_cast %15 : vector<128xf32> to vector<1x128xf32>
    %17 = arith.addf %13, %16 : vector<1x128xf32>
    %c1_12 = arith.constant 1 : index
    %c0_13 = arith.constant 0 : index
    %18 = vector.load %arg4[%c1_12, %c0_13] : memref<8x128xf32, #tpu.memory_space<vmem>>, vector<1x128xf32>
    tpu.vector_store %arg4[%c1_12, %c0_13], %17 {strides = array<i32>} : memref<8x128xf32, #tpu.memory_space<vmem>>, vector<1x128xf32>,
    return
  }
  func.func @transform_0(%arg0: i32, %arg1: i32) -> (i32, i32) {
    %c2_i32 = arith.constant 2 : i32
    %0 = arith.muli %arg0, %c2_i32 : i32
    %1 = arith.addi %0, %arg1 : i32
    %c0_i32 = arith.constant 0 : i32
    %c0_i32_0 = arith.constant 0 : i32
    return %1, %c0_i32 : i32, i32
  }
  func.func @transform_1(%arg0: i32, %arg1: i32) -> (i32, i32) {
    %c0_i32 = arith.constant 0 : i32
    %c0_i32_0 = arith.constant 0 : i32
    %c0_i32_1 = arith.constant 0 : i32
    return %c0_i32, %c0_i32_0 : i32, i32
  }
  func.func @transform_2(%arg0: i32, %arg1: i32) -> (i32, i32) {
    %c0_i32 = arith.constant 0 : i32
    %c0_i32_0 = arith.constant 0 : i32
    return %arg0, %c0_i32 : i32, i32
  }
}

</mosaic_0001>

<bundles_post_ra>
// kernel: tpu_custom_call.1
= control target key start
LH: loop header
LB: loop body
LE: loop exit
PB: predicated region body
PF: predicated region fallthrough
CT: control target
= control target key end

     0   :  { %7 = vsyncpa [#allocation3], 0  ;;  %s999_s0 = inlined_call_operand.vmem [shape: f32[512,4], index: 0, kind: input, shape index: {}]   ;;  %s1000_s1 = inlined_call_operand.vmem [shape: f32[4,128], index: 1, kind: input, shape index: {}]   ;;  %s1001_s2 = inlined_call_operand.hbm [shape: f32[16,128], index: 2, kind: output, shape index: {}]  }
   0x1   :  { %9 = vsyncpa [#allocation3 + $0x1], 0  ;;  %s817_s9 = smov 0   ;;  %s819_s10 = smov 0  }
   0x2   :  { %s821_s11 = smov 0   ;;  %s823_s12 = smov 0  }
   0x3   :  { %s825_s13 = smov 0   ;;  %s827_s14 = smov 0  }
   0x4   :  { %s829_s15 = smov 0   ;;  %s831_s16 = smov 0  }
   0x5 LB: > { %s554_s17 = sadd.s32 4294967295, %s798_s16   ;;  %s555_s18 = sadd.s32 4294967294, %s798_s16   ;;  %s798_s16 = sphi %s831_s16, %s15_s16   ;;  %s794_s15 = sphi %s829_s15, %s1010_s15   ;;  %s790_s14 = sphi %s827_s14, %s1009_s14   ;;  %s786_s13 = sphi %s825_s13, %s1008_s13   ;;  %s782_s12 = sphi %s823_s12, %s1007_s12   ;;  %s778_s11 = sphi %s821_s11, %s1006_s11   ;;  %s774_s10 = sphi %s819_s10, %s1005_s10   ;;  %s770_s9 = sphi %s817_s9, %s1004_s9  }
   0x6   : > { %s24_s19 = sadd.s32 1, %s790_s14  ;;  %s27_s20 = sadd.s32 1, %s794_s15 }
   0x7   : > { %p25_p0 = scmp.ge.s32.totalorder %s24_s19, 2  ;;  %p95_p1 = scmp.ne.s32.totalorder %s778_s11, %s774_s10 }
   0x8   : > { %p96_p2 = scmp.eq.s32.totalorder %s554_s17, 3  ;;  %p101_p4 = scmp.ne.s32.totalorder %s774_s10, %s770_s9 }
   0x9   : > { %s1012_s19 = smov (%p25_p0, %s24_s19), 0  ;;  %s1014_s20 = smov (!%p25_p0, %s27_s20), %s794_s15 }
   0xa   : > { %p866_p3 = por %p96_p2, %p95_p1  ;;  %p29_p5 = scmp.ge.s32.totalorder %s1014_s20, 2 }
   0xb   : > { %p102_p6 = scmp.eq.s32.totalorder %s555_s18, 3  ;;  %p560_p7 = scmp.ge.s32.totalorder %s798_s16, 1 }
   0xc   : > { %p136_p8 = scmp.lt.s32.totalorder %s798_s16, 5  ;;  %s1016_s20 = smov (%p29_p5, %s1014_s20), 0 }
   0xd   : > { %p876_p9 = por %p102_p6, %p101_p4  ;;  %s82_s23 = ssub.s32 %s794_s15, %s1016_s20 }
   0xe   : > { %p137_p10 = pnand %p560_p7, %p136_p8  ;;  %s85_s24 = sadd.s32 1, %s778_s11 }
   0xf   : > { %p83_p11 = scmp.eq.s32.totalorder %s82_s23, 0  ;;  %s157_s26 = sand.u32 (!%p137_p10), 1, %s774_s10  }
  0x10   : > { %140 = sbr.rel (%p137_p10) target bundleno = 310 (0x136), region = 28  ;;  %s562_s27 = sshll.u32 (!%p137_p10), %s786_s13, 1 }
  0x11   : > { %s884_s25 = scalar_select %p83_p11, %s778_s11, %s85_s24  }
  0x12   : > { %s561_s28 = sshll.u32 (!%p137_p10), %s157_s26, 3  ;;  %s161_s29 = sadd.s32 (!%p137_p10), %s782_s12, %s562_s27 }
  0x13   : > { %s563_s30 = sshll.u32 (!%p137_p10), %s161_s29, 4  ;;  %s896_s7 = scalar_lea.vmem (!%p137_p10), [#allocation2], %s561_s28 }
  0x14   : > { %p163_p12 = scmp.lt.s32.totalorder (!%p137_p10), %s563_s30, 63  ;;  %p565_p13 = scmp.ne.s32.totalorder (!%p137_p10), %s782_s12, 0 }
  0x17   : > { %s1018_s30 = smov (!%p163_p12, %s563_s30), 63  ;;  %173 = sbr.rel (%p565_p13) target bundleno = 30 (0x1e), region = 32 }
  0x18   : > { %s564_s3 = sshll.u32 %s1018_s30, 3  ;;  %v800_v0 = vmov (!%p565_p13), 0.0  }
  0x19   : > { %s894_s6 = scalar_lea.vmem %s999_s0, %s564_s3  ;;  %174 = vst [vmem:[%s896_s7] sm:$0xff] (!%p565_p13), %v800_v0 }
  0x1e PF: > { %v207_v1 = vld [vmem:[%s1000_s1] sm:$0xf]  ;;  %vm257_vm0 = vcmask 1043456   ;;  %vm208_vm1 = vcmask 31744   ;;  %v176_v3 = vld [vmem:[%s894_s6 + $0x8] sm:$0xff]  ;;  %v177_v6 = vld [vmem:[%s894_s6 + $0x10] sm:$0xff] }
  0x1f   : > { %v175_v2 = vld [vmem:[%s894_s6] sm:$0xff]  ;;  %604 = vmatprep.subr.msk.mxu0 %vm257_vm0, %v207_v1  ;;  %v192_v5 = vmax.f32 %v176_v3, 0.0  ;;  %v178_v7 = vld [vmem:[%s894_s6 + $0x18] sm:$0xff]  ;;  %630 = vmatprep.subr.msk.mxu1 %vm257_vm0, %v207_v1  ;;  %v193_v8 = vmax.f32 %v177_v6, 0.0  ;;  %v184_v11 = vld [vmem:[%s894_s6 + $0x48] sm:$0xff]  ;;  %s584_s12 = sshll.u32 %s786_s13, 7 }
  0x20   : > { %v191_v4 = vmax.f32 %v175_v2, 0.0  ;;  %605 = vmatpush3.msk.msra.mxu0 %vm257_vm0, %v207_v1  ;;  %v179_v9 = vld [vmem:[%s894_s6 + $0x20] sm:$0xff]  ;;  %631 = vmatpush3.msk.msra.mxu1 %vm257_vm0, %v207_v1  ;;  %v185_v12 = vld [vmem:[%s894_s6 + $0x50] sm:$0xff]  ;;  %v194_v13 = vmax.f32 %v178_v7, 0.0  ;;  %v200_v15 = vmax.f32 %v184_v11, 0.0  ;;  %v186_v17 = vld [vmem:[%s894_s6 + $0x58] sm:$0xff]  ;;  %s943_s27 = scalar_lea.hbm %s1001_s2, %s584_s12 }
  0x21   : > { %v183_v10 = vld [vmem:[%s894_s6 + $0x40] sm:$0xff]  ;;  %v201_v16 = vmax.f32 %v185_v12, 0.0  ;;  %v195_v18 = vmax.f32 %v179_v9, 0.0  ;;  %v180_v19 = vld [vmem:[%s894_s6 + $0x28] sm:$0xff]  ;;  %v181_v21 = vld [vmem:[%s894_s6 + $0x30] sm:$0xff]  ;;  %v202_v22 = vmax.f32 %v186_v17, 0.0 }
  0x22   : > { %606 = vmatprep.mubr.msk.f32.mxu0 %vm208_vm1, %v191_v4  ;;  %v199_v14 = vmax.f32 %v183_v10, 0.0  ;;  %v187_v20 = vld [vmem:[%s894_s6 + $0x60] sm:$0xff]  ;;  %v196_v23 = vmax.f32 %v180_v19, 0.0  ;;  %v188_v25 = vld [vmem:[%s894_s6 + $0x68] sm:$0xff]  ;;  %v197_v26 = vmax.f32 %v181_v21, 0.0  ;;  %v182_v27 = vld [vmem:[%s894_s6 + $0x38] sm:$0xff] }
  0x23   : > { %607 = vmatmul.mubr.msk.f32.vlgmr.msra.gmra.mrb[0].mxu0 %vm208_vm1, %v192_v5  ;;  %v203_v24 = vmax.f32 %v187_v20, 0.0  ;;  %v189_v28 = vld [vmem:[%s894_s6 + $0x70] sm:$0xff]  ;;  %v204_v29 = vmax.f32 %v188_v25, 0.0  ;;  %v198_v30 = vmax.f32 %v182_v27, 0.0  ;;  %v190_v32 = vld [vmem:[%s894_s6 + $0x78] sm:$0xff]  ;;  %s484_s18 = sshll.u32 %s896_s7, 4  ;;  %s945_s18 = int_to_ptr.vmem [resolvable:$true] %s484_s18 }
  0x24   : > { %609 = vmatprep.mubr.msk.f32.mxu0 %vm208_vm1, %v193_v8  ;;  %618 = vmatprep.mubr.msk.f32.mxu1 %vm208_vm1, %v199_v14  ;;  %v205_v31 = vmax.f32 %v189_v28, 0.0  ;;  %v206_v33 = vmax.f32 %v190_v32, 0.0  ;;  %s471_s28 = scalar_lea.sflag [#allocation3], %s157_s26  ;;  %s704_s29 = scalar_lea.vmem %s945_s18, 128 }
  0x25   : > { %619 = vmatmul.mubr.msk.f32.vlgmr.msra.gmra.mrb[0].mxu1 %vm208_vm1, %v200_v15  ;;  %p705_p0 = scmp.ne.s32.totalorder %s945_s18, %s704_s29  ;;  %s801_s13 = smov [#allocation2]  }
  0x26   : > { %621 = vmatprep.mubr.msk.f32.mxu1 %vm208_vm1, %v201_v16  ;;  %s708_s30 = sshll.u32 %s801_s13, 4  ;;  %s709_s30 = int_to_ptr.vmem [resolvable:$false] %s708_s30 }
  0x27   : > { %610 = vmatmul.mubr.msk.f32.gmra.mrb[2].mxu0 %vm208_vm1, %v194_v13  ;;  %p706_p1 = pnand %p705_p0, %p866_p3  ;;  %s710_s3 = scalar_lea.vmem %s709_s30, 256 }
  0x28   : > { %612 = vmatprep.mubr.msk.f32.mxu0 %vm208_vm1, %v195_v18  ;;  %p711_p4 = scmp.lt.s32.totalorder %s945_s18, %s709_s30  ;;  %p712_p5 = scmp.lt.s32.totalorder %s710_s3, %s704_s29 }
  0x29   : > { %622 = vmatmul.mubr.msk.f32.gmra.mrb[2].mxu1 %vm208_vm1, %v202_v22  ;;  %p707_p2 = pneg %p706_p1 }
  0x2a   : > { %624 = vmatprep.mubr.msk.f32.mxu1 %vm208_vm1, %v203_v24  ;;  %p713_p6 = por %p712_p5, %p711_p4 }
  0x2b   : > { %613 = vmatmul.mubr.msk.f32.gmra.mrb[4].mxu0 %vm208_vm1, %v196_v23 }
  0x2c   : > { %615 = vmatprep.mubr.msk.f32.mxu0 %vm208_vm1, %v197_v26  ;;  %p714_p7 = pnand %p713_p6, %p707_p2 }
  0x2d   : > { %625 = vmatmul.mubr.msk.f32.gmra.mrb[4].mxu1 %vm208_vm1, %v204_v29 }
  0x2e   : > { %627 = vmatprep.mubr.msk.f32.mxu1 %vm208_vm1, %v205_v31 }
  0x2f   : > { %616 = vmatmul.mubr.msk.f32.gmra.mrb[6].mxu0 %vm208_vm1, %v198_v30 }
  0x31   : > { %628 = vmatmul.mubr.msk.f32.gmra.mrb[6].mxu1 %vm208_vm1, %v206_v33 }
  0xf6   : > { %v608_v34 = vpop.f32.mrb[0].mxu0 }
  0xf7   : > { %v432_v35 = vmul.f32 %v608_v34, %v608_v34  ;;  %v327_v36 = vpop.f32.mrb[1].mxu0 }
  0xf8   : > { %v407_v37 = vadd.f32 %v608_v34, %v327_v36  ;;  %v431_v38 = vmul.f32 %v327_v36, %v327_v36  ;;  %v620_v39 = vpop.f32.mrb[0].mxu1 }
  0xf9   : > { %v367_v42 = vpop.f32.mrb[1].mxu1  ;;  %v440_v10 = vmul.f32 %v620_v39, %v620_v39 }
  0xfa   : > { %v447_v40 = vadd.f32 %v432_v35, %v431_v38  ;;  %v611_v41 = vpop.f32.mrb[2].mxu0  ;;  %v439_v6 = vmul.f32 %v367_v42, %v367_v42 }
  0xfb   : > { %v337_v43 = vpop.f32.mrb[3].mxu0  ;;  %v434_v47 = vmul.f32 %v611_v41, %v611_v41 }
  0xfc   : > { %v408_v44 = vadd.f32 %v407_v37, %v337_v43  ;;  %v433_v45 = vmul.f32 %v337_v43, %v337_v43  ;;  %v623_v46 = vpop.f32.mrb[2].mxu1 }
  0xfd   : > { %v377_v51 = vpop.f32.mrb[3].mxu1  ;;  %v442_v16 = vmul.f32 %v623_v46, %v623_v46 }
  0xfe   : > { %v448_v48 = vadd.f32 %v447_v40, %v433_v45  ;;  %v614_v49 = vpop.f32.mrb[4].mxu0  ;;  %v409_v50 = vadd.f32 %v611_v41, %v408_v44  ;;  %v441_v13 = vmul.f32 %v377_v51, %v377_v51  ;;  %v406_v41 = vld [vmem:[%s896_s7] sm:$0x1]  ;;  %v430_v44 = vld [vmem:[%s896_s7 + $0x1] sm:$0x1] }
  0xff   : > { %v347_v52 = vpop.f32.mrb[5].mxu0  ;;  %v436_v57 = vmul.f32 %v614_v49, %v614_v49 }
 0x100   : > { %v410_v53 = vadd.f32 %v409_v50, %v347_v52  ;;  %v435_v54 = vmul.f32 %v347_v52, %v347_v52  ;;  %v449_v55 = vadd.f32 %v448_v48, %v434_v47  ;;  %v626_v56 = vpop.f32.mrb[4].mxu1 }
 0x101   : > { %v387_v61 = vpop.f32.mrb[5].mxu1  ;;  %v444_v22 = vmul.f32 %v626_v56, %v626_v56 }
 0x102   : > { %v450_v58 = vadd.f32 %v449_v55, %v435_v54  ;;  %v617_v59 = vpop.f32.mrb[6].mxu0  ;;  %v411_v60 = vadd.f32 %v614_v49, %v410_v53  ;;  %v443_v19 = vmul.f32 %v387_v61, %v387_v61 }
 0x103   : > { %v357_v62 = vpop.f32.mrb[7].mxu0  ;;  %v438_v3 = vmul.f32 %v617_v59, %v617_v59 }
 0x104   : > { %v412_v63 = vadd.f32 %v411_v60, %v357_v62  ;;  %v437_v0 = vmul.f32 %v357_v62, %v357_v62  ;;  %v451_v1 = vadd.f32 %v450_v58, %v436_v57  ;;  %v629_v2 = vpop.f32.mrb[6].mxu1 }
 0x105   : > { %v397_v7 = vpop.f32.mrb[7].mxu1  ;;  %v446_v28 = vmul.f32 %v629_v2, %v629_v2 }
 0x106   : > { %v413_v4 = vadd.f32 %v617_v59, %v412_v63  ;;  %v452_v5 = vadd.f32 %v451_v1, %v437_v0  ;;  %v445_v25 = vmul.f32 %v397_v7, %v397_v7 }
 0x108   : > { %v453_v8 = vadd.f32 %v452_v5, %v438_v3  ;;  %v414_v9 = vadd.f32 %v413_v4, %v367_v42 }
 0x10a   : > { %v454_v11 = vadd.f32 %v453_v8, %v439_v6  ;;  %v415_v12 = vadd.f32 %v620_v39, %v414_v9 }
 0x10c   : > { %v416_v14 = vadd.f32 %v415_v12, %v377_v51  ;;  %v455_v15 = vadd.f32 %v454_v11, %v440_v10 }
 0x10e   : > { %v456_v17 = vadd.f32 %v455_v15, %v441_v13  ;;  %v417_v18 = vadd.f32 %v623_v46, %v416_v14 }
 0x110   : > { %v418_v20 = vadd.f32 %v417_v18, %v387_v61  ;;  %v457_v21 = vadd.f32 %v456_v17, %v442_v16 }
 0x112   : > { %v458_v23 = vadd.f32 %v457_v21, %v443_v19  ;;  %v419_v24 = vadd.f32 %v626_v56, %v418_v20 }
 0x114   : > { %v420_v26 = vadd.f32 %v419_v24, %v397_v7  ;;  %v459_v27 = vadd.f32 %v458_v23, %v444_v22 }
 0x116   : > { %v421_v29 = vadd.f32 %v629_v2, %v420_v26  ;;  %v460_v30 = vadd.f32 %v459_v27, %v445_v25 }
 0x118   : > { %v422_v31 = vrot.slane %v421_v29, 4  ;;  %v461_v32 = vadd.f32 %v460_v30, %v446_v28 }
 0x11a   : > { %v423_v33 = vadd.f32 %v422_v31, %v421_v29  ;;  %v462_v34 = vrot.slane %v461_v32, 4 }
 0x11c   : > { %v424_v35 = vrot.slane %v423_v33, 2  ;;  %v463_v36 = vadd.f32 %v462_v34, %v461_v32 }
 0x11e   : > { %v425_v37 = vadd.f32 %v424_v35, %v423_v33  ;;  %v464_v38 = vrot.slane %v463_v36, 2 }
 0x120   : > { %v426_v39 = vrot.slane %v425_v37, 1  ;;  %v465_v40 = vadd.f32 %v464_v38, %v463_v36 }
 0x122   : > { %v427_v42 = vadd.f32 %v426_v39, %v425_v37  ;;  %v466_v43 = vrot.slane %v465_v40, 1 }
 0x124   : > { %v428_v45 = vadd.f32 %v427_v42, %v406_v41  ;;  %v467_v46 = vadd.f32 %v466_v43, %v465_v40 }
 0x126   : > { %429 = vst [vmem:[%s896_s7] sm:$0x1] %v428_v45  ;;  %v468_v47 = vadd.f32 %v467_v46, %v430_v44 }
 0x128   : > { %469 = vst [vmem:[%s896_s7 + $0x1] sm:$0x1] %v468_v47 }
 0x129   : > { %717 = shalt.err (!%p714_p7)
}
 0x12a   : > { %s718_s26 = scalar_lea.hbm %s943_s27, 128  ;;  %s722_s6 = scalar_lea.hbm %s1001_s2, 256 }
 0x12b   : > { %p719_p8 = scmp.ne.s32.totalorder %s943_s27, %s718_s26  ;;  %p723_p12 = scmp.lt.u32.totalorder %s943_s27, %s1001_s2 }
 0x12c   : > { %p724_p13 = scmp.lt.u32.totalorder %s722_s6, %s718_s26  ;;  %p726_p1 = scmp.lt.u32.totalorder %s718_s26, %s943_s27 }
 0x12d   : > { %p720_p10 = pnand %p719_p8, %p866_p3 }
 0x12e   : > { %p725_p0 = por %p724_p13, %p723_p12 }
 0x12f   : > { %p721_p11 = pneg %p720_p10 }
 0x130   : > { %p727_p2 = por %p726_p1, %p725_p0 }
 0x132   : > { %p728_p4 = pnand %p727_p2, %p721_p11 }
 0x134   : > { %731 = shalt.err (!%p728_p4)
}
 0x135   : > { %632 = dma.vmem_to_hbm [thread:$0]  (%p866_p3), %s945_s18, 128, %s943_s27, %s471_s28  }
 0x136 PF: > { %p638_p5 = scmp.ge.s32.totalorder %s798_s16, 2  ;;  %s496_s17 = sand.u32 1, %s770_s9  }
 0x137   : > { %s497_s12 = scalar_lea.sflag [#allocation3], %s496_s17 }
 0x138   : > { %p635_p6 = pnand %p638_p5, %p876_p9 }
 0x13a   : > { %765 = dma.done.wait (!%p635_p6), %s497_s12, 128  }
 0x13b   : > { %767 = vsyncadd (!%p635_p6), %s497_s12, 4294967168  ;;  %s15_s16 = sadd.s32 1, %s798_s16   ;;  %s1004_s9 = smov %s774_s10 }
 0x13c   : > { %p12_p7 = scmp.ge.s32.totalorder %s15_s16, 6   ;;  %s1005_s10 = smov %s778_s11 }
 0x13d   : > { %s1006_s11 = smov %s884_s25  ;;  %s1007_s12 = smov %s790_s14 }
 0x13e   : > { %s1008_s13 = smov %s794_s15  ;;  %s1009_s14 = smov %s1012_s19 }
 0x13f   : > { %s1010_s15 = smov %s1016_s20  ;;  %14 = sbr.rel (!%p12_p7) target bundleno = 5 (0x5), region = 67 }
 0x146   :  { %502 = vsyncpa [#allocation3], 1 }
 0x147   :  { %504 = vsyncpa [#allocation3 + $0x1], 1 }

</bundles_post_ra>
